<compile_context>
chip_gen: v5e
topology: v5e:2x2
jax: 0.10.0
libtpu: 0.0.40
codegen_flags: <defaults>
</compile_context>

<pallas_src>
from functools import lru_cache, partial

import jax
import jax.numpy as jnp
from jax.experimental import pallas as pl
from jax.experimental.pallas import tpu as pltpu


_MIB = 1024 * 1024
_MIN_BLOCK_BYTES = 256 * 1024    # never shrink blocks below this just to add steps
_MIN_GRID_STEPS = 8              # v7x: 2 TCs x pipeline depth >= 4


def _round_up(x, m):
    return ((x + m - 1) // m) * m


def _sublane_multiple(dtype):
    # Sub-32-bit dtypes pack along sublanes: one vreg is (8,128) f32,
    # (16,128) bf16, (32,128) int8/fp8.
    itemsize = jnp.dtype(dtype).itemsize
    return max(8, 32 // max(1, itemsize))


@lru_cache(maxsize=None)
def _chip_tuning():
    """Returns (target_block_bytes, vmem_limit_bytes) from physical VMEM size."""
    cap = None
    try:
        cap = getattr(pltpu.get_tpu_info(), "vmem_capacity_bytes", None)
    except Exception:
        cap = None
    if cap is None:
        cap = 64 * _MIB                       # conservative (v7x-sized) default
    if cap >= 96 * _MIB:                      # v5e / v6e: 128 MiB physical VMEM
        return 4 * _MIB, 64 * _MIB
    return 6 * _MIB, 48 * _MIB                # v7x-class: 64 MiB physical VMEM


def _pick_block_rows(rows, width, dtype, target_bytes):
    """Rows per block for a (rows, width) slab with `width` on the lane axis."""
    mult = _sublane_multiple(dtype)
    if rows <= mult:
        return rows                           # single full block (block == full dim)
    rows_pad = _round_up(rows, mult)
    bytes_per_row = max(1, width * jnp.dtype(dtype).itemsize)
    target = max(mult, (target_bytes // bytes_per_row) // mult * mult)
    # Aim for >= ~8 grid steps on big inputs (pipelined work for both v7x TCs) ...
    steps = max(mult, _round_up(pl.cdiv(rows, _MIN_GRID_STEPS), mult))
    # ... but never shrink below ~256 KiB blocks just to manufacture steps.
    floor = max(mult, (_MIN_BLOCK_BYTES // bytes_per_row) // mult * mult)
    br = min(target, max(steps, min(floor, rows_pad)))
    return min(br, rows_pad)


def _pick_hw_tile(hw, c, n, dtype, target_bytes):
    """Lane tile for the (C, H*W) channels_first layout (H*W on the lane axis)."""
    if hw <= 128:
        # TODO(synk): HorNet late stages (7x7=49) leave >half of every vreg
        # masked; fixing that needs a fused NCHW->(C, N*H*W) relayout upstream.
        return hw
    hw_pad = _round_up(hw, 128)
    bytes_per_lane = max(1, c * jnp.dtype(dtype).itemsize)
    target = max(128, (target_bytes // bytes_per_lane) // 128 * 128)
    steps_per_img = max(1, pl.cdiv(_MIN_GRID_STEPS, max(1, n)))
    steps = max(128, _round_up(pl.cdiv(hw, steps_per_img), 128))
    floor = max(128, (_MIN_BLOCK_BYTES // bytes_per_lane) // 128 * 128)
    t = min(target, max(steps, min(floor, hw_pad)))
    return min(t, hw_pad)


# ----------------------------- kernels ---------------------------------------


def _ln_lastdim_kernel(x_ref, w_ref, b_ref, o_ref, *, eps, inv_c):
    # x_ref: (block_rows, C); w_ref/b_ref: (1, C). Normalize over the lane (C)
    # axis (C == full lane dim). Shifted two-pass stats in f32 (torch parity).
    x = x_ref[...].astype(jnp.float32)
    mean = jnp.sum(x, axis=-1, keepdims=True) * inv_c
    d = x - mean
    var = jnp.sum(d * d, axis=-1, keepdims=True) * inv_c
    inv = jax.lax.rsqrt(var + eps)
    w = w_ref[...].astype(jnp.float32)
    b = b_ref[...].astype(jnp.float32)
    o_ref[...] = (d * inv * w + b).astype(o_ref.dtype)


def _ln_lastdim_packed_kernel(x_ref, m_ref, w_ref, b_ref, o_ref, *, eps, inv_c):
    # x_ref: (block_rows, g*C) — g segments of C channels per packed, lane-dense
    # row.  m_ref: (g*C, g*C) block-diagonal ones matrix; x @ m yields each
    # segment's sum broadcast back over that segment's lanes, on the MXU (no
    # XLU cross-lane reduce, no in-kernel reshape, unmasked lane-dense stores).
    x = x_ref[...].astype(jnp.float32)
    m = m_ref[...]
    mean = jnp.dot(x, m, preferred_element_type=jnp.float32) * inv_c
    d = x - mean
    var = jnp.dot(d * d, m, preferred_element_type=jnp.float32) * inv_c
    inv = jax.lax.rsqrt(var + eps)
    o_ref[...] = (d * inv * w_ref[...] + b_ref[...]).astype(o_ref.dtype)


def _ln_chanfirst_kernel(x_ref, w_ref, b_ref, o_ref, *, eps, inv_c):
    # x_ref: (C, hw_tile); w_ref/b_ref: (C, 1). Normalize over the sublane (C)
    # axis; the lane axis (H*W) stays dense -> unmasked stores for hw >= 128.
    x = x_ref[...].astype(jnp.float32)
    mean = jnp.sum(x, axis=0, keepdims=True) * inv_c
    d = x - mean
    var = jnp.sum(d * d, axis=0, keepdims=True) * inv_c
    inv = jax.lax.rsqrt(var + eps)
    w = w_ref[...].astype(jnp.float32)
    b = b_ref[...].astype(jnp.float32)
    o_ref[...] = (d * inv * w + b).astype(o_ref.dtype)


# ----------------------------- wrappers ---------------------------------------


def _layernorm_channels_last(x2d, weight, bias, eps):
    rows, c = x2d.shape
    target_bytes, vmem_limit = _chip_tuning()

    g = (128 // c) if (c < 128 and 128 % c == 0) else 1
    if g > 1:
        # Lane-dense packing: (rows, C) -> (rows/g, g*C == 128). The reshape is
        # a free row-major relabel; pad the row count to a multiple of g only
        # when needed (tiny copy, padded rows are sliced off afterwards).
        rows_total = _round_up(rows, g)
        if rows_total != rows:
            x2d = jnp.pad(x2d, ((0, rows_total - rows), (0, 0)))
        width = g * c
        xp = x2d.reshape(rows_total // g, width)
        seg = jnp.arange(width) // c
        m = (seg[:, None] == seg[None, :]).astype(jnp.float32)   # block-diag ones
        w_tiled = jnp.tile(weight.astype(jnp.float32), g).reshape(1, width)
        b_tiled = jnp.tile(bias.astype(jnp.float32), g).reshape(1, width)
        rp = xp.shape[0]
        br = _pick_block_rows(rp, width, xp.dtype, target_bytes)
        yp = pl.pallas_call(
            partial(_ln_lastdim_packed_kernel, eps=eps, inv_c=1.0 / c),
            out_shape=jax.ShapeDtypeStruct((rp, width), xp.dtype),
            grid_spec=pltpu.PrefetchScalarGridSpec(
                num_scalar_prefetch=0,
                grid=(pl.cdiv(rp, br),),
                in_specs=[
                    pl.BlockSpec((br, width), lambda i: (i, 0)),
                    pl.BlockSpec((width, width), lambda i: (0, 0)),
                    pl.BlockSpec((1, width), lambda i: (0, 0)),
                    pl.BlockSpec((1, width), lambda i: (0, 0)),
                ],
                out_specs=pl.BlockSpec((br, width), lambda i: (i, 0)),
            ),
            compiler_params=pltpu.CompilerParams(
                dimension_semantics=("parallel",),
                vmem_limit_bytes=vmem_limit),
        )(xp, m, w_tiled, b_tiled)
        y2d = yp.reshape(rows_total, c)
        if rows_total != rows:
            y2d = y2d[:rows]
        return y2d

    # Fallback: C on the lane axis directly (C >= 128 or not a divisor of 128).
    br = _pick_block_rows(rows, c, x2d.dtype, target_bytes)
    return pl.pallas_call(
        partial(_ln_lastdim_kernel, eps=eps, inv_c=1.0 / c),
        out_shape=jax.ShapeDtypeStruct((rows, c), x2d.dtype),
        grid_spec=pltpu.PrefetchScalarGridSpec(
            num_scalar_prefetch=0,
            grid=(pl.cdiv(rows, br),),
            in_specs=[
                pl.BlockSpec((br, c), lambda i: (i, 0)),
                pl.BlockSpec((1, c), lambda i: (0, 0)),
                pl.BlockSpec((1, c), lambda i: (0, 0)),
            ],
            out_specs=pl.BlockSpec((br, c), lambda i: (i, 0)),
        ),
        compiler_params=pltpu.CompilerParams(
            dimension_semantics=("parallel",),
            vmem_limit_bytes=vmem_limit),
    )(x2d, weight.reshape(1, c), bias.reshape(1, c))


def _layernorm_channels_first(x, weight, bias, eps):
    n, c, h, w = x.shape
    hw = h * w
    target_bytes, vmem_limit = _chip_tuning()
    x3 = x.reshape(n, c, hw)
    t = _pick_hw_tile(hw, c, n, x.dtype, target_bytes)
    grid = (n, pl.cdiv(hw, t))
    y3 = pl.pallas_call(
        partial(_ln_chanfirst_kernel, eps=eps, inv_c=1.0 / c),
        out_shape=jax.ShapeDtypeStruct((n, c, hw), x.dtype),
        grid_spec=pltpu.PrefetchScalarGridSpec(
            num_scalar_prefetch=0,
            grid=grid,
            in_specs=[
                pl.BlockSpec((None, c, t), lambda i, j: (i, 0, j)),
                pl.BlockSpec((c, 1), lambda i, j: (0, 0)),
                pl.BlockSpec((c, 1), lambda i, j: (0, 0)),
            ],
            out_specs=pl.BlockSpec((None, c, t), lambda i, j: (i, 0, j)),
        ),
        compiler_params=pltpu.CompilerParams(
            dimension_semantics=("parallel", "parallel"),
            vmem_limit_bytes=vmem_limit),
    )(x3, weight.reshape(c, 1), bias.reshape(c, 1))
    return y3.reshape(n, c, h, w)


class LayerNorm:
    """JAX/Pallas port of HorNet LayerNorm (channels_last / channels_first)."""

    def __init__(self, normalized_shape, eps=1e-6, data_format="channels_last"):
        if data_format not in ("channels_last", "channels_first"):
            raise NotImplementedError
        self.eps = float(eps)
        self.data_format = data_format
        self.normalized_shape = (normalized_shape,)
        # deterministic init: ones / zeros, exactly like the torch module
        self.weight = jnp.ones((normalized_shape,), dtype=jnp.float32)
        self.bias = jnp.zeros((normalized_shape,), dtype=jnp.float32)

    def __call__(self, x):
        c = self.normalized_shape[0]
        if self.data_format == "channels_last":
            orig_shape = x.shape
            assert orig_shape[-1] == c
            x2d = x.reshape(-1, c)
            y2d = _layernorm_channels_last(x2d, self.weight, self.bias, self.eps)
            return y2d.reshape(orig_shape)
        else:
            n, xc, h, w = x.shape
            assert xc == c
            return _layernorm_channels_first(x, self.weight, self.bias, self.eps)


# ----------------------------- references & test ------------------------------


def _ref_channels_first(x, w, b, eps):
    u = x.mean(axis=1, keepdims=True)
    s = ((x - u) ** 2).mean(axis=1, keepdims=True)
    xn = (x - u) / jnp.sqrt(s + eps)
    return w[None, :, None, None] * xn + b[None, :, None, None]


def _ref_channels_last(x, w, b, eps):
    u = x.mean(axis=-1, keepdims=True)
    s = ((x - u) ** 2).mean(axis=-1, keepdims=True)
    xn = (x - u) / jnp.sqrt(s + eps)
    return xn * w + b


if __name__ == "__main__":
    key = jax.random.PRNGKey(0)
    k1, k2, k3, k4, k5 = jax.random.split(key, 5)

    C = 32

    # channels_first: NCHW = (2, 32, 16, 16)
    x_cf = jax.random.normal(k1, (2, C, 16, 16), dtype=jnp.float32)
    ln_cf = LayerNorm(C, eps=1e-6, data_format="channels_first")
    y_cf = jax.block_until_ready(ln_cf(x_cf))
    ref_cf = _ref_channels_first(x_cf, ln_cf.weight, ln_cf.bias, ln_cf.eps)
    assert y_cf.shape == x_cf.shape
    assert jnp.allclose(y_cf, ref_cf, atol=1e-4, rtol=1e-4)

    # channels_first with ragged H*W (144): exercises the partial lane block
    x_cf2 = jax.random.normal(k2, (2, C, 9, 16), dtype=jnp.float32)
    y_cf2 = jax.block_until_ready(ln_cf(x_cf2))
    ref_cf2 = _ref_channels_first(x_cf2, ln_cf.weight, ln_cf.bias, ln_cf.eps)
    assert jnp.allclose(y_cf2, ref_cf2, atol=1e-4, rtol=1e-4)

    # channels_last: NHWC = (2, 16, 16, 32) — packed MXU path (g = 4, width 128)
    x_cl = jax.random.normal(k3, (2, 16, 16, C), dtype=jnp.float32)
    ln_cl = LayerNorm(C, eps=1e-6, data_format="channels_last")
    y_cl = jax.block_until_ready(ln_cl(x_cl))
    ref_cl = _ref_channels_last(x_cl, ln_cl.weight, ln_cl.bias, ln_cl.eps)
    assert y_cl.shape == x_cl.shape
    assert jnp.allclose(y_cl, ref_cl, atol=1e-4, rtol=1e-4)

    # channels_last, ragged row count (3*5*7 = 105 rows): packed path with pad
    x_cl2 = jax.random.normal(k4, (3, 5, 7, C), dtype=jnp.float32)
    y_cl2 = jax.block_until_ready(ln_cl(x_cl2))
    ref_cl2 = _ref_channels_last(x_cl2, ln_cl.weight, ln_cl.bias, ln_cl.eps)
    assert jnp.allclose(y_cl2, ref_cl2, atol=1e-4, rtol=1e-4)

    # channels_last with C=48 (not a divisor of 128): exercises fallback path
    x_cl3 = jax.random.normal(k5, (2, 4, 4, 48), dtype=jnp.float32)
    ln_cl3 = LayerNorm(48, eps=1e-6, data_format="channels_last")
    y_cl3 = jax.block_until_ready(ln_cl3(x_cl3))
    ref_cl3 = _ref_channels_last(x_cl3, ln_cl3.weight, ln_cl3.bias, ln_cl3.eps)
    assert jnp.allclose(y_cl3, ref_cl3, atol=1e-4, rtol=1e-4)

    print("KERNEL_OK")
</pallas_src>

<mosaic_0001>
module attributes {stable_mosaic.version = 11 : i64} {
  func.func @_ln_chanfirst_kernel(%arg0: i32, %arg1: i32, %arg2: memref<1x32x256xf32, #tpu.memory_space<vmem>>, %arg3: memref<32x1xf32, #tpu.memory_space<vmem>>, %arg4: memref<32x1xf32, #tpu.memory_space<vmem>>, %arg5: memref<1x32x256xf32, #tpu.memory_space<vmem>>) attributes {dimension_semantics = [#tpu.dimension_semantics<parallel>, #tpu.dimension_semantics<parallel>], iteration_bounds = array<i64: 2, 1>, scalar_prefetch = 0 : i64, scratch_operands = 0 : i64, tpu.core_type = #tpu.core_type<tc>, window_params = [{transform_indices = @transform_0, window_bounds = array<i64: 1, 32, 256>}, {pipeline_mode = #tpu.pipeline_mode<synchronous>, transform_indices = @transform_1, window_bounds = array<i64: 32, 1>}, {pipeline_mode = #tpu.pipeline_mode<synchronous>, transform_indices = @transform_2, window_bounds = array<i64: 32, 1>}, {transform_indices = @transform_3, window_bounds = array<i64: 1, 32, 256>}]} {
    %c0 = arith.constant 0 : index
    %c0_0 = arith.constant 0 : index
    %c0_1 = arith.constant 0 : index
    %0 = vector.load %arg2[%c0, %c0_0, %c0_1] : memref<1x32x256xf32, #tpu.memory_space<vmem>>, vector<1x32x256xf32>
    %1 = vector.shape_cast %0 : vector<1x32x256xf32> to vector<32x256xf32>
    %cst = arith.constant dense<0.000000e+00> : vector<256xf32>
    %2 = vector.multi_reduction <add>, %1, %cst [0] : vector<32x256xf32> to vector<256xf32>
    %3 = vector.shape_cast %2 : vector<256xf32> to vector<1x256xf32>
    %cst_2 = arith.constant 3.125000e-02 : f32
    %4 = vector.broadcast %cst_2 : f32 to vector<1x256xf32>
    %5 = arith.mulf %3, %4 : vector<1x256xf32>
    %6 = vector.broadcast %5 : vector<1x256xf32> to vector<32x256xf32>
    %7 = arith.subf %1, %6 : vector<32x256xf32>
    %8 = arith.mulf %7, %7 : vector<32x256xf32>
    %cst_3 = arith.constant dense<0.000000e+00> : vector<256xf32>
    %9 = vector.multi_reduction <add>, %8, %cst_3 [0] : vector<32x256xf32> to vector<256xf32>
    %10 = vector.shape_cast %9 : vector<256xf32> to vector<1x256xf32>
    %cst_4 = arith.constant 3.125000e-02 : f32
    %11 = vector.broadcast %cst_4 : f32 to vector<1x256xf32>
    %12 = arith.mulf %10, %11 : vector<1x256xf32>
    %cst_5 = arith.constant 9.99999997E-7 : f32
    %13 = vector.broadcast %cst_5 : f32 to vector<1x256xf32>
    %14 = arith.addf %12, %13 : vector<1x256xf32>
    %15 = math.rsqrt %14 : vector<1x256xf32>
    %c0_6 = arith.constant 0 : index
    %c0_7 = arith.constant 0 : index
    %16 = vector.load %arg3[%c0_6, %c0_7] : memref<32x1xf32, #tpu.memory_space<vmem>>, vector<32x1xf32>
    %c0_8 = arith.constant 0 : index
    %c0_9 = arith.constant 0 : index
    %17 = vector.load %arg4[%c0_8, %c0_9] : memref<32x1xf32, #tpu.memory_space<vmem>>, vector<32x1xf32>
    %18 = vector.broadcast %15 : vector<1x256xf32> to vector<32x256xf32>
    %19 = arith.mulf %7, %18 : vector<32x256xf32>
    %20 = vector.broadcast %16 : vector<32x1xf32> to vector<32x256xf32>
    %21 = arith.mulf %19, %20 : vector<32x256xf32>
    %22 = vector.broadcast %17 : vector<32x1xf32> to vector<32x256xf32>
    %23 = arith.addf %21, %22 : vector<32x256xf32>
    %c0_10 = arith.constant 0 : index
    %c0_11 = arith.constant 0 : index
    %c0_12 = arith.constant 0 : index
    %24 = vector.load %arg5[%c0_10, %c0_11, %c0_12] : memref<1x32x256xf32, #tpu.memory_space<vmem>>, vector<1x32x256xf32>
    %25 = vector.shape_cast %24 : vector<1x32x256xf32> to vector<32x256xf32>
    %26 = vector.shape_cast %23 : vector<32x256xf32> to vector<1x32x256xf32>
    tpu.vector_store %arg5[%c0_10, %c0_11, %c0_12], %26 {strides = array<i32>} : memref<1x32x256xf32, #tpu.memory_space<vmem>>, vector<1x32x256xf32>,
    return
  }
  func.func @transform_0(%arg0: i32, %arg1: i32) -> (i32, i32, i32) {
    %c0_i32 = arith.constant 0 : i32
    %c0_i32_0 = arith.constant 0 : i32
    return %arg0, %c0_i32, %arg1 : i32, i32, i32
  }
  func.func @transform_1(%arg0: i32, %arg1: i32) -> (i32, i32) {
    %c0_i32 = arith.constant 0 : i32
    %c0_i32_0 = arith.constant 0 : i32
    %c0_i32_1 = arith.constant 0 : i32
    return %c0_i32, %c0_i32_0 : i32, i32
  }
  func.func @transform_2(%arg0: i32, %arg1: i32) -> (i32, i32) {
    %c0_i32 = arith.constant 0 : i32
    %c0_i32_0 = arith.constant 0 : i32
    %c0_i32_1 = arith.constant 0 : i32
    return %c0_i32, %c0_i32_0 : i32, i32
  }
  func.func @transform_3(%arg0: i32, %arg1: i32) -> (i32, i32, i32) {
    %c0_i32 = arith.constant 0 : i32
    %c0_i32_0 = arith.constant 0 : i32
    return %arg0, %c0_i32, %arg1 : i32, i32, i32
  }
}

</mosaic_0001>

<bundles_post_ra>
// kernel: tpu_custom_call.1
= control target key start
LH: loop header
LB: loop body
LE: loop exit
PB: predicated region body
PF: predicated region fallthrough
CT: control target
= control target key end

     0   :  { %8 = vsyncpa [#allocation3], 0  ;;  %s911_s0 = inlined_call_operand.hbm [shape: f32[2,32,256], index: 0, kind: input, shape index: {}]   ;;  %s912_s1 = inlined_call_operand.vmem [shape: f32[32,1], index: 1, kind: input, shape index: {}]   ;;  %s913_s2 = inlined_call_operand.vmem [shape: f32[32,1], index: 2, kind: input, shape index: {}]   ;;  %s914_s3 = inlined_call_operand.hbm [shape: f32[2,32,256], index: 3, kind: output, shape index: {}]  }
   0x1   :  { %10 = vsyncpa [#allocation3 + $0x1], 0 }
   0x2   :  { %11 = vsyncpa [#allocation4], 0 }
   0x3   :  { %13 = vsyncpa [#allocation4 + $0x1], 0  ;;  %s712_s12 = smov 0   ;;  %s714_s13 = smov 0  }
   0x4   :  { %s716_s14 = smov 0   ;;  %s718_s15 = smov 0  }
   0x5   :  { %s720_s16 = smov 0   ;;  %s722_s17 = smov 0  }
   0x6 LB: > { %s482_s18 = sadd.s32 4294967295, %s685_s17   ;;  %s483_s19 = sadd.s32 4294967294, %s685_s17   ;;  %s685_s17 = sphi %s722_s17, %s19_s17   ;;  %s681_s16 = sphi %s720_s16, %s923_s16   ;;  %s677_s15 = sphi %s718_s15, %s922_s15   ;;  %s673_s14 = sphi %s716_s14, %s921_s14   ;;  %s669_s13 = sphi %s714_s13, %s920_s13   ;;  %s665_s12 = sphi %s712_s12, %s919_s12  }
   0x7   : > { %s31_s20 = sadd.s32 1, %s681_s16  ;;  %s40_s21 = sadd.s32 1, %s673_s14 }
   0x8   : > { %p33_p0 = scmp.ge.s32.totalorder %s31_s20, 2  ;;  %p47_p1 = scmp.ne.s32.totalorder %s673_s14, %s669_s13 }
   0x9   : > { %p48_p2 = scmp.eq.s32.totalorder %s685_s17, 0  ;;  %p53_p3 = scmp.ne.s32.totalorder %s669_s13, %s665_s12 }
   0xa   : > { %s925_s20 = smov (%p33_p0, %s31_s20), 0  ;;  %p54_p5 = scmp.eq.s32.totalorder %s482_s18, 0 }
   0xb   : > { %p753_p4 = por %p48_p2, %p47_p1  ;;  %s35_s23 = ssub.s32 %s681_s16, %s925_s20 }
   0xc   : > { %p121_p6 = scmp.eq.s32.totalorder %s482_s18, 1  ;;  %p38_p7 = scmp.eq.s32.totalorder %s35_s23, 0 }
   0xd   : > { %p759_p8 = por %p54_p5, %p53_p3  ;;  %p127_p10 = scmp.eq.s32.totalorder %s483_s19, 1 }
   0xe   : > { %p763_p9 = por %p121_p6, %p47_p1  ;;  %p485_p12 = scmp.ge.s32.totalorder %s685_s17, 2 }
   0xf   : > { %s768_s26 = scalar_select %p38_p7, %s673_s14, %s40_s21  }
  0x10   : > { %p770_p11 = por %p127_p10, %p53_p3  ;;  %p511_p13 = scmp.lt.s32.totalorder %s685_s17, 2 }
  0x11   : > { %s153_s28 = sand.u32 1, %s673_s14   ;;  %s497_s30 = sshll.u32 %s681_s16, 6 }
  0x12   : > { %s486_s29 = sshll.u32 %s153_s28, 6  ;;  %s164_s6 = scalar_lea.hbm %s911_s0, %s497_s30 }
  0x13   : > { %s157_s7 = scalar_lea.vmem [#allocation2], %s486_s29  ;;  %s165_s9 = sshll.u32 %s164_s6, 4  ;;  %s166_s9 = int_to_ptr.hbm [resolvable:$true] %s165_s9 }
  0x14   : > { %s167_s8 = sshll.u32 %s157_s7, 4  ;;  %p504_p0 = pnand %p511_p13, %p753_p4  ;;  %s168_s8 = int_to_ptr.vmem [resolvable:$true] %s167_s8 }
  0x15   : > { %p489_p1 = scmp.ge.s32.totalorder %s685_s17, 1  ;;  %s154_s10 = scalar_lea.sflag [#allocation3], %s153_s28 }
  0x16   : > { %s687_s11 = smov 256   ;;  %s688_s18 = smov 16  }
  0x17   : > { %506 = dma.hbm_to_vmem [thread:$0]  (!%p504_p0), %s166_s9, 1024, %s168_s8, %s154_s10, %s687_s11, %s687_s11, %s688_s18  }
  0x18   : > { %p175_p2 = scmp.lt.s32.totalorder %s685_s17, 3 }
  0x1a   : > { %p176_p3 = pnand %p489_p1, %p175_p2 }
  0x1b   : > { %s786_s19 = sand.u32 (!%p176_p3), 1, %s669_s13  }
  0x1c   : > { %179 = sbr.rel (%p176_p3) target bundleno = 176 (0xb0), region = 32  ;;  %s490_s21 = sshll.u32 (!%p176_p3), %s786_s19, 6 }
  0x1d   : > { %s182_s23 = scalar_lea.sflag (!%p176_p3), [#allocation3], %s786_s19  ;;  %s792_s22 = scalar_lea.vmem (!%p176_p3), [#allocation2], %s490_s21 }
  0x21   : > { %656 = dma.done.wait (%p759_p8), %s182_s23, 1024  }
  0x22   : > { %658 = vsyncadd (%p759_p8), %s182_s23, 4294966272  ;;  %v689_v0 = vmov 0   ;;  %v299_v1 = vld [vmem:[%s912_s1 + $0x10] sm:$0xff]  ;;  %v297_v2 = vld [vmem:[%s912_s1] sm:$0xff]  ;;  %s378_s6 = scalar_lea.sflag [#allocation4], %s786_s19  ;;  %s623_s11 = scalar_lea.hbm %s914_s3, 128 }
  0x23   : > { %567 = vset.pattern.permute.xlu1 %v689_v0  ;;  %566 = vset.pattern.permute.xlu0 %v689_v0  ;;  %v301_v3 = vld [vmem:[%s913_s2] sm:$0xff]  ;;  %v300_v4 = vld [vmem:[%s912_s1 + $0x18] sm:$0xff]  ;;  %v298_v5 = vld [vmem:[%s912_s1 + $0x8] sm:$0xff] }
  0x24   : > { %568 = vset.pattern.permute.xlu2 %v689_v0  ;;  %325 = vperm.xlu1 %567, %v299_v1   ;;  %v302_v6 = vld [vmem:[%s913_s2 + $0x8] sm:$0xff]  ;;  %v304_v7 = vld [vmem:[%s913_s2 + $0x18] sm:$0xff]  ;;  %v303_v8 = vld [vmem:[%s913_s2 + $0x10] sm:$0xff] }
  0x25   : > { %315 = vperm.xlu0 %566, %v297_v2   ;;  %343 = vperm.xlu2 %568, %v301_v3   ;;  %v211_v9 = vld [vmem:[%s792_s22] sm:$0xff]  ;;  %v212_v10 = vld [vmem:[%s792_s22 + $0x8] sm:$0xff]  ;;  %v213_v11 = vld [vmem:[%s792_s22 + $0x10] sm:$0xff] }
  0x26   : > { %v214_v12 = vld [vmem:[%s792_s22 + $0x18] sm:$0xff]  ;;  %v219_v13 = vadd.f32 %v213_v11, %v211_v9  ;;  %v215_v14 = vld [vmem:[%s792_s22 + $0x20] sm:$0xff]  ;;  %v216_v15 = vld [vmem:[%s792_s22 + $0x28] sm:$0xff] }
  0x27   : > { %v228_v16 = vadd.f32 %v214_v12, %v212_v10  ;;  %v217_v18 = vld [vmem:[%s792_s22 + $0x30] sm:$0xff]  ;;  %v218_v19 = vld [vmem:[%s792_s22 + $0x38] sm:$0xff]  ;;  %s856_s22 = scalar_lea.vmem [#allocation5], %s490_s21  ;;  %s498_s21 = sshll.u32 %s677_s15, 6 }
  0x28   : > { %v220_v17 = vadd.f32 %v219_v13, %v215_v14  ;;  %s391_s5 = scalar_lea.hbm %s914_s3, %s498_s21  ;;  %s392_s15 = sshll.u32 %s856_s22, 4  ;;  %s393_s15 = int_to_ptr.vmem [resolvable:$true] %s392_s15 }
  0x29   : > { %v229_v20 = vadd.f32 %v228_v16, %v216_v15  ;;  %s394_s24 = sshll.u32 %s391_s5, 4  ;;  %s395_s24 = int_to_ptr.hbm [resolvable:$true] %s394_s24 }
  0x2a   : > { %v221_v21 = vadd.f32 %v220_v17, %v217_v18  ;;  %s617_s7 = sshra.s32 %s395_s24, 4  ;;  %s618_s7 = int_to_ptr.hbm [resolvable:$true] %s617_s7 }
  0x2b   : > { %v230_v22 = vadd.f32 %v229_v20, %v218_v19  ;;  %s619_s8 = scalar_lea.hbm %s618_s7, 64  ;;  %p624_p7 = scmp.lt.s32.totalorder %s618_s7, %s914_s3 }
  0x2c   : > { %330 = vperm.xlu1 %567, %v300_v4   ;;  %v222_v23 = vrot.slane %v221_v21, 4  ;;  %p620_p4 = scmp.ne.s32.totalorder %s618_s7, %s619_s8  ;;  %p625_p8 = scmp.lt.s32.totalorder %s623_s11, %s619_s8 }
  0x2d   : > { %320 = vperm.xlu0 %566, %v298_v5   ;;  %348 = vperm.xlu2 %568, %v302_v6   ;;  %v231_v24 = vrot.slane %v230_v22, 4 }
  0x2e   : > { %v223_v25 = vadd.f32 %v222_v23, %v221_v21  ;;  %p621_p5 = pnand %p620_p4, %p763_p9  ;;  %p626_p10 = por %p625_p8, %p624_p7 }
  0x2f   : > { %v232_v26 = vadd.f32 %v231_v24, %v230_v22 }
  0x30   : > { %v224_v27 = vrot.slane %v223_v25, 2  ;;  %p622_p6 = pneg %p621_p5 }
  0x31   : > { %v233_v28 = vrot.slane %v232_v26, 2 }
  0x32   : > { %v225_v29 = vadd.f32 %v224_v27, %v223_v25  ;;  %p627_p13 = pnand %p626_p10, %p622_p6 }
  0x33   : > { %v234_v30 = vadd.f32 %v233_v28, %v232_v26 }
  0x34   : > { %358 = vperm.xlu1 %567, %v304_v7   ;;  %v226_v31 = vrot.slane %v225_v29, 1 }
  0x35   : > { %353 = vperm.xlu0 %566, %v303_v8   ;;  %v235_v32 = vrot.slane %v234_v30, 1 }
  0x36   : > { %v227_v33 = vadd.f32 %v226_v31, %v225_v29 }
  0x37   : > { %v236_v34 = vadd.f32 %v235_v32, %v234_v30 }
  0x38   : > { %v237_v35 = vmul.f32 0.03125, %v227_v33 }
  0x39   : > { %v238_v36 = vmul.f32 0.03125, %v236_v34 }
  0x3a   : > { %v239_v37 = vsub.f32 %v211_v9, %v237_v35  ;;  %v830_v38 = vsub.f32 %v213_v11, %v237_v35  ;;  %v834_v41 = vsub.f32 %v215_v14, %v237_v35  ;;  %v842_v47 = vsub.f32 %v217_v18, %v237_v35 }
  0x3b   : > { %v240_v39 = vsub.f32 %v212_v10, %v238_v36  ;;  %v832_v40 = vsub.f32 %v214_v12, %v238_v36  ;;  %v836_v42 = vsub.f32 %v216_v15, %v238_v36  ;;  %v844_v48 = vsub.f32 %v218_v19, %v238_v36 }
  0x3c   : > { %v247_v43 = vmul.f32 %v239_v37, %v239_v37  ;;  %v249_v44 = vmul.f32 %v830_v38, %v830_v38  ;;  %v251_v49 = vmul.f32 %v834_v41, %v834_v41  ;;  %v253_v53 = vmul.f32 %v842_v47, %v842_v47 }
  0x3d   : > { %v248_v45 = vmul.f32 %v240_v39, %v240_v39  ;;  %v250_v46 = vmul.f32 %v832_v40, %v832_v40  ;;  %v252_v50 = vmul.f32 %v836_v42, %v836_v42  ;;  %v254_v54 = vmul.f32 %v844_v48, %v844_v48 }
  0x3e   : > { %v255_v51 = vadd.f32 %v249_v44, %v247_v43 }
  0x3f   : > { %v264_v52 = vadd.f32 %v250_v46, %v248_v45 }
  0x40   : > { %v256_v55 = vadd.f32 %v255_v51, %v251_v49 }
  0x41   : > { %v265_v56 = vadd.f32 %v264_v52, %v252_v50 }
  0x42   : > { %v257_v57 = vadd.f32 %v256_v55, %v253_v53 }
  0x43   : > { %v266_v58 = vadd.f32 %v265_v56, %v254_v54 }
  0x44   : > { %v258_v59 = vrot.slane %v257_v57, 4 }
  0x45   : > { %v267_v60 = vrot.slane %v266_v58, 4 }
  0x46   : > { %v259_v61 = vadd.f32 %v258_v59, %v257_v57 }
  0x47   : > { %v268_v62 = vadd.f32 %v267_v60, %v266_v58 }
  0x48   : > { %v260_v63 = vrot.slane %v259_v61, 2 }
  0x49   : > { %v269_v0 = vrot.slane %v268_v62, 2 }
  0x4a   : > { %v261_v1 = vadd.f32 %v260_v63, %v259_v61 }
  0x4b   : > { %v270_v2 = vadd.f32 %v269_v0, %v268_v62 }
  0x4c   : > { %v262_v3 = vrot.slane %v261_v1, 1 }
  0x4d   : > { %v271_v4 = vrot.slane %v270_v2, 1 }
  0x4e   : > { %v263_v5 = vadd.f32 %v262_v3, %v261_v1 }
  0x4f   : > { %v272_v6 = vadd.f32 %v271_v4, %v270_v2 }
  0x50   : > { %v273_v7 = vmul.f32 0.03125, %v263_v5 }
  0x51   : > { %v274_v8 = vmul.f32 0.03125, %v272_v6 }
  0x52   : > { %v275_v9 = vadd.f32 1e-06, %v273_v7 }
  0x53   : > { %v276_v10 = vadd.f32 1e-06, %v274_v8 }
  0x54   : > { %569 = vrsqrt.f32 %v275_v9  ;;  %vm283_vm0 = vweird.f32 %v275_v9 }
  0x55   : > { %571 = vrsqrt.f32 %v276_v10  ;;  %vm293_vm2 = vweird.f32 %v276_v10 }
  0x5a   : > { %v570_v11 = vpop.eup %569 }
  0x5b   : > { %v572_v12 = vpop.eup %571  ;;  %v278_v13 = vmul.f32 %v570_v11, %v275_v9  ;;  %vm284_vm1 = vweird.f32 %v570_v11 }
  0x5c   : > { %v288_v14 = vmul.f32 %v572_v12, %v276_v10  ;;  %vm294_vm3 = vweird.f32 %v572_v12  ;;  %vm285_vm4 = vmor %vm283_vm0, %vm284_vm1 }
  0x5d   : > { %v279_v15 = vmul.f32 %v570_v11, %v278_v13  ;;  %vm295_vm5 = vmor %vm293_vm2, %vm294_vm3 }
  0x5e   : > { %v289_v16 = vmul.f32 %v572_v12, %v288_v14 }
  0x5f   : > { %v280_v17 = vmul.f32 0.5, %v279_v15 }
  0x60   : > { %v290_v18 = vmul.f32 0.5, %v289_v16 }
  0x61   : > { %v281_v19 = vsub.f32 1.5, %v280_v17 }
  0x62   : > { %v291_v20 = vsub.f32 1.5, %v290_v18 }
  0x63   : > { %v282_v21 = vmul.f32 %v570_v11, %v281_v19 }
  0x64   : > { %v292_v22 = vmul.f32 %v572_v12, %v291_v20 }
  0x65   : > { %v286_v23 = vsel %vm285_vm4, %v570_v11, %v282_v21 }
  0x66   : > { %v296_v24 = vsel %vm295_vm5, %v572_v12, %v292_v22  ;;  %v305_v25 = vmul.f32 %v286_v23, %v239_v37  ;;  %v307_v34 = vmul.f32 %v286_v23, %v830_v38  ;;  %v309_v44 = vmul.f32 %v286_v23, %v834_v41 }
  0x67   : > { %v306_v26 = vmul.f32 %v296_v24, %v240_v39  ;;  %v308_v35 = vmul.f32 %v296_v24, %v832_v40  ;;  %v311_v46 = vmul.f32 %v286_v23, %v842_v47  ;;  %v312_v49 = vmul.f32 %v296_v24, %v844_v48 }
  0x68   : > { %v310_v38 = vmul.f32 %v296_v24, %v836_v42 }
  0x7f   : > { %v344_v27 = vpop.permute.xlu2 %343 }
  0x87   : > { %v349_v45 = vpop.permute.xlu2 %348 }
  0x96   : > { %v326_v28 = vpop.permute.xlu1 %325 }
  0x97   : > { %v316_v29 = vpop.permute.xlu0 %315  ;;  %v337_v40 = vmul.f32 %v326_v28, %v309_v44  ;;  %v338_v47 = vmul.f32 %v326_v28, %v310_v38 }
  0x98   : > { %v333_v30 = vmul.f32 %v316_v29, %v305_v25  ;;  %v334_v31 = vmul.f32 %v316_v29, %v306_v26 }
  0x9a   : > { %v361_v32 = vadd.f32 %v344_v27, %v333_v30  ;;  %v362_v33 = vadd.f32 %v344_v27, %v334_v31 }
  0x9c   : > { %369 = vst [vmem:[%s856_s22] sm:$0xff] %v361_v32 }
  0x9d   : > { %370 = vst [vmem:[%s856_s22 + $0x8] sm:$0xff] %v362_v33 }
  0x9e   : > { %v331_v36 = vpop.permute.xlu1 %330 }
  0x9f   : > { %v321_v37 = vpop.permute.xlu0 %320  ;;  %v339_v41 = vmul.f32 %v331_v36, %v311_v46  ;;  %v340_v52 = vmul.f32 %v331_v36, %v312_v49 }
  0xa0   : > { %v335_v39 = vmul.f32 %v321_v37, %v307_v34  ;;  %v336_v43 = vmul.f32 %v321_v37, %v308_v35 }
  0xa2   : > { %v363_v50 = vadd.f32 %v349_v45, %v335_v39  ;;  %v364_v51 = vadd.f32 %v349_v45, %v336_v43 }
  0xa4   : > { %371 = vst [vmem:[%s856_s22 + $0x10] sm:$0xff] %v363_v50 }
  0xa5   : > { %372 = vst [vmem:[%s856_s22 + $0x18] sm:$0xff] %v364_v51 }
  0xa6   : > { %v359_v48 = vpop.permute.xlu1 %358 }
  0xa7   : > { %v354_v53 = vpop.permute.xlu0 %353  ;;  %v367_v42 = vadd.f32 %v359_v48, %v339_v41  ;;  %v368_v54 = vadd.f32 %v359_v48, %v340_v52 }
  0xa8   : > { %v365_v55 = vadd.f32 %v354_v53, %v337_v40  ;;  %v366_v56 = vadd.f32 %v354_v53, %v338_v47 }
  0xa9   : > { %375 = vst [vmem:[%s856_s22 + $0x30] sm:$0xff] %v367_v42 }
  0xaa   : > { %376 = vst [vmem:[%s856_s22 + $0x38] sm:$0xff] %v368_v54 }
  0xab   : > { %373 = vst [vmem:[%s856_s22 + $0x20] sm:$0xff] %v365_v55 }
  0xac   : > { %374 = vst [vmem:[%s856_s22 + $0x28] sm:$0xff] %v366_v56 }
  0xad   : > { %630 = shalt.err (!%p627_p13)
}
  0xae   : > { %s690_s19 = smov 256   ;;  %s691_s28 = smov 16  }
  0xaf   : > { %501 = dma.vmem_to_hbm [thread:$0]  (%p763_p9), %s393_s15, 1024, %s395_s24, %s378_s6, %s690_s19, %s690_s19, %s691_s28  }
  0xb0 PF: > { %s409_s29 = sand.u32 1, %s665_s12   ;;  %p508_p0 = pnand %p485_p12, %p770_p11 }
  0xb1   : > { %s410_s22 = scalar_lea.sflag [#allocation4], %s409_s29 }
  0xb2   : > { %p509_p1 = pneg %p508_p0 }
  0xb4   : > { %660 = dma.done.wait (%p509_p1), %s410_s22, 1024  }
  0xb5   : > { %662 = vsyncadd (%p509_p1), %s410_s22, 4294966272  ;;  %s19_s17 = sadd.s32 1, %s685_s17   ;;  %s919_s12 = smov %s669_s13 }
  0xb6   : > { %p16_p2 = scmp.ge.s32.totalorder %s19_s17, 4   ;;  %s920_s13 = smov %s673_s14 }
  0xb7   : > { %s921_s14 = smov %s768_s26  ;;  %s922_s15 = smov %s681_s16 }
  0xb8   : > { %s923_s16 = smov %s925_s20  ;;  %18 = sbr.rel (!%p16_p2) target bundleno = 6 (0x6), region = 77 }
  0xbd   :  { %416 = vsyncpa [#allocation3], 1 }
  0xbe   :  { %418 = vsyncpa [#allocation3 + $0x1], 1 }
  0xbf   :  { %419 = vsyncpa [#allocation4], 1 }
  0xc0   :  { %421 = vsyncpa [#allocation4 + $0x1], 1 }

</bundles_post_ra>
